<compile_context>
chip_gen: v5e
topology: v5e:2x2
jax: 0.10.0
libtpu: 0.0.40
codegen_flags: <defaults>
</compile_context>

<pallas_src>
import jax
import jax.numpy as jnp
from jax.experimental import pallas as pl
from jax.experimental.pallas import tpu as pltpu


# ---------------------------------------------------------------------------
# Kernel
# ---------------------------------------------------------------------------
def _make_resnet_kernel(cin, cout, L, project):
    def kernel(x_ref, p_ref, w1_ref, w2_ref, o_ref):
        x = x_ref[...]                                   # (Cin, B*L) f32
        BL = x.shape[1]

        # ---- packed per-channel params (single small DMA) ----------------
        p = p_ref[...]                                   # (Cmax, 8)
        g1, b1 = p[:cin, 0:1], p[:cin, 1:2]
        g2, b2 = p[:cout, 2:3], p[:cout, 3:4]
        bias2 = p[:cout, 4:5]                            # conv2_b (+ proj_b)

        # ---- hoisted k=3 edge masks (shared by conv1 and conv2) ----------
        pos = jax.lax.broadcasted_iota(jnp.int32, (1, BL), dimension=1) % L
        not_left = (pos != 0).astype(jnp.float32)        # kill wrap at l == 0
        not_right = (pos != L - 1).astype(jnp.float32)   # kill wrap at l == L-1

        def k3_window(h):
            """(C, B*L) -> (3C, B*L): rows = [x[l-1]; x[l]; x[l+1]], zero pad."""
            left = pltpu.roll(h, shift=1, axis=1) * not_left
            right = pltpu.roll(h, shift=BL - 1, axis=1) * not_right
            return jnp.concatenate([left, h, right], axis=0)

        def bn_relu(h, g, b):
            """Training-mode BatchNorm1d (biased var, eps=1e-5) + ReLU."""
            n = h.shape[1]
            mean = jnp.sum(h, axis=1, keepdims=True) / n
            d = h - mean
            var = jnp.sum(d * d, axis=1, keepdims=True) / n
            y = d * jax.lax.rsqrt(var + 1e-5) * g + b
            return jnp.maximum(y, 0.0)

        # ---- norm1 + relu -> conv1 (one dot; bias cancelled by BN2) -------
        h = bn_relu(x, g1, b1)
        h1 = jnp.dot(w1_ref[...], k3_window(h),
                     preferred_element_type=jnp.float32)  # (Cout, B*L)

        # ---- norm2 + relu (dropout p=0.0 is the identity) -----------------
        h2 = bn_relu(h1, g2, b2)

        # ---- conv2 (+ fused 1x1 projection residual) ----------------------
        win2 = k3_window(h2)                              # (3*Cout, B*L)
        if project:
            rhs = jnp.concatenate([win2, x], axis=0)      # (3*Cout+Cin, B*L)
            o_ref[...] = jnp.dot(w2_ref[...], rhs,
                                 preferred_element_type=jnp.float32) + bias2
        else:
            o_ref[...] = (jnp.dot(w2_ref[...], win2,
                                  preferred_element_type=jnp.float32)
                          + bias2 + x)

    return kernel


# ---------------------------------------------------------------------------
# Wrapper: one fused pallas_call for the whole block
# ---------------------------------------------------------------------------
def resnet_block_1d(x, params):
    """x: (B, C_in, L) f32 -> (B, C_out, L) f32 (PyTorch NCL convention)."""
    B, Cin, L = x.shape
    Cout = params["conv1_w"].shape[0]
    project = Cin != Cout
    Cmax = max(Cin, Cout)
    BL = B * L

    # Flatten batch into the lane axis: (B, Cin, L) -> (Cin, B*L).
    x2 = jnp.transpose(x, (1, 0, 2)).reshape(Cin, BL)

    # Pack conv weights (Cout, Cin, 3) -> (Cout, 3*Cin) matching the window
    # row order [x(l-1); x(l); x(l+1)] (tap k = contiguous block of Cin rows).
    w1p = jnp.transpose(params["conv1_w"], (0, 2, 1)).reshape(Cout, 3 * Cin)
    w2p = jnp.transpose(params["conv2_w"], (0, 2, 1)).reshape(Cout, 3 * Cout)
    bias2 = params["conv2_b"]
    if project:
        # Fuse the 1x1 projection into the conv2 dot.
        w2p = jnp.concatenate([w2p, params["proj_w"]], axis=1)   # (Cout, 3*Cout+Cin)
        bias2 = bias2 + params["proj_b"]
    K2 = w2p.shape[1]

    # Consolidate all tiny per-channel params into one packed array.
    pk = jnp.zeros((Cmax, 8), jnp.float32)
    pk = pk.at[:Cin, 0:1].set(params["g1"])
    pk = pk.at[:Cin, 1:2].set(params["b1"])
    pk = pk.at[:Cout, 2:3].set(params["g2"])
    pk = pk.at[:Cout, 3:4].set(params["b2"])
    pk = pk.at[:Cout, 4:5].set(bias2)
    # NOTE: conv1_b deliberately not passed (cancelled by training-mode BN2).

    out2 = pl.pallas_call(
        _make_resnet_kernel(Cin, Cout, L, project),
        out_shape=jax.ShapeDtypeStruct((Cout, BL), jnp.float32),
        grid=(1,),
        in_specs=[
            pl.BlockSpec((Cin, BL), lambda i: (0, 0)),
            pl.BlockSpec((Cmax, 8), lambda i: (0, 0)),
            pl.BlockSpec((Cout, 3 * Cin), lambda i: (0, 0)),
            pl.BlockSpec((Cout, K2), lambda i: (0, 0)),
        ],
        out_specs=pl.BlockSpec((Cout, BL), lambda i: (0, 0)),
        compiler_params=pltpu.CompilerParams(
            dimension_semantics=("arbitrary",),
            vmem_limit_bytes=32 * 1024 * 1024,
        ),
    )(x2, pk, w1p, w2p)

    # (Cout, B*L) -> (B, Cout, L)
    return out2.reshape(Cout, B, L).transpose(1, 0, 2)


# ---------------------------------------------------------------------------
# Pure-JAX reference (for correctness verification)
# ---------------------------------------------------------------------------
def resnet_block_1d_ref(x, params):
    Cin = x.shape[1]
    Cout = params["conv1_w"].shape[0]
    hi = jax.lax.Precision.HIGHEST

    def bn_relu(h, g, b):
        mean = jnp.mean(h, axis=(0, 2), keepdims=True)
        var = jnp.mean(jnp.square(h - mean), axis=(0, 2), keepdims=True)
        y = (h - mean) * jax.lax.rsqrt(var + 1e-5) * g.reshape(1, -1, 1) \
            + b.reshape(1, -1, 1)
        return jnp.maximum(y, 0.0)

    def conv3(h, w, b):
        out = jax.lax.conv_general_dilated(
            h, w, window_strides=(1,), padding=((1, 1),),
            dimension_numbers=("NCH", "OIH", "NCH"), precision=hi)
        return out + b.reshape(1, -1, 1)

    h = bn_relu(x, params["g1"], params["b1"])
    h = conv3(h, params["conv1_w"], params["conv1_b"])   # bias kept here
    h = bn_relu(h, params["g2"], params["b2"])
    h = conv3(h, params["conv2_w"], params["conv2_b"])
    if Cin != Cout:
        res = jnp.einsum("oc,bcl->bol", params["proj_w"], x, precision=hi) \
            + params["proj_b"].reshape(1, -1, 1)
    else:
        res = x
    return h + res


# ---------------------------------------------------------------------------
# Deterministic synthetic parameters
# ---------------------------------------------------------------------------
def init_params(key, cin, cout):
    keys = iter(jax.random.split(key, 16))

    def rnd(shape, scale=0.1):
        return scale * jax.random.normal(next(keys), shape, dtype=jnp.float32)

    p = {
        "g1": 1.0 + rnd((cin, 1)), "b1": rnd((cin, 1)),
        "conv1_w": rnd((cout, cin, 3)), "conv1_b": rnd((cout, 1)),
        "g2": 1.0 + rnd((cout, 1)), "b2": rnd((cout, 1)),
        "conv2_w": rnd((cout, cout, 3)), "conv2_b": rnd((cout, 1)),
    }
    if cin != cout:
        p["proj_w"] = rnd((cout, cin))       # Conv1d(cin, cout, kernel_size=1)
        p["proj_b"] = rnd((cout, 1))
    return p


if __name__ == "__main__":
    key = jax.random.PRNGKey(0)
    k_p1, k_x1, k_p2, k_x2 = jax.random.split(key, 4)

    # Case 1: in_channels != out_channels  (fused projection residual path)
    B, Cin, Cout, L = 2, 32, 16, 128
    params1 = init_params(k_p1, Cin, Cout)
    x1 = jax.random.normal(k_x1, (B, Cin, L), dtype=jnp.float32)
    out1 = jax.block_until_ready(resnet_block_1d(x1, params1))
    ref1 = resnet_block_1d_ref(x1, params1)
    assert out1.shape == (B, Cout, L), out1.shape
    assert bool(jnp.all(jnp.isfinite(out1)))
    assert float(jnp.max(jnp.abs(out1 - ref1))) < 1e-3

    # Case 2: in_channels == out_channels  (identity residual path)
    C = 16
    params2 = init_params(k_p2, C, C)
    x2 = jax.random.normal(k_x2, (B, C, L), dtype=jnp.float32)
    out2 = jax.block_until_ready(resnet_block_1d(x2, params2))
    ref2 = resnet_block_1d_ref(x2, params2)
    assert out2.shape == (B, C, L), out2.shape
    assert bool(jnp.all(jnp.isfinite(out2)))
    assert float(jnp.max(jnp.abs(out2 - ref2))) < 1e-3

    print("KERNEL_OK")
</pallas_src>

<mosaic_0001>
module attributes {stable_mosaic.version = 11 : i64} {
  func.func @kernel(%arg0: i32, %arg1: memref<32x256xf32, #tpu.memory_space<vmem>>, %arg2: memref<32x8xf32, #tpu.memory_space<vmem>>, %arg3: memref<16x96xf32, #tpu.memory_space<vmem>>, %arg4: memref<16x80xf32, #tpu.memory_space<vmem>>, %arg5: memref<16x256xf32, #tpu.memory_space<vmem>>) attributes {dimension_semantics = [#tpu.dimension_semantics<arbitrary>], iteration_bounds = array<i64: 1>, scalar_prefetch = 0 : i64, scratch_operands = 0 : i64, tpu.core_type = #tpu.core_type<tc>, window_params = [{pipeline_mode = #tpu.pipeline_mode<synchronous>, transform_indices = @transform_0, window_bounds = array<i64: 32, 256>}, {pipeline_mode = #tpu.pipeline_mode<synchronous>, transform_indices = @transform_1, window_bounds = array<i64: 32, 8>}, {pipeline_mode = #tpu.pipeline_mode<synchronous>, transform_indices = @transform_2, window_bounds = array<i64: 16, 96>}, {pipeline_mode = #tpu.pipeline_mode<synchronous>, transform_indices = @transform_3, window_bounds = array<i64: 16, 80>}, {pipeline_mode = #tpu.pipeline_mode<synchronous>, transform_indices = @transform_4, window_bounds = array<i64: 16, 256>}]} {
    %c0 = arith.constant 0 : index
    %c0_0 = arith.constant 0 : index
    %0 = vector.load %arg1[%c0, %c0_0] : memref<32x256xf32, #tpu.memory_space<vmem>>, vector<32x256xf32>
    %c0_1 = arith.constant 0 : index
    %c0_2 = arith.constant 0 : index
    %1 = vector.load %arg2[%c0_1, %c0_2] : memref<32x8xf32, #tpu.memory_space<vmem>>, vector<32x8xf32>
    %2 = vector.extract_strided_slice %1 {offsets = [0, 0], sizes = [32, 1], strides = [1, 1]} : vector<32x8xf32> to vector<32x1xf32>
    %3 = vector.extract_strided_slice %1 {offsets = [0, 1], sizes = [32, 1], strides = [1, 1]} : vector<32x8xf32> to vector<32x1xf32>
    %4 = vector.extract_strided_slice %1 {offsets = [0, 2], sizes = [16, 1], strides = [1, 1]} : vector<32x8xf32> to vector<16x1xf32>
    %5 = vector.extract_strided_slice %1 {offsets = [0, 3], sizes = [16, 1], strides = [1, 1]} : vector<32x8xf32> to vector<16x1xf32>
    %6 = vector.extract_strided_slice %1 {offsets = [0, 4], sizes = [16, 1], strides = [1, 1]} : vector<32x8xf32> to vector<16x1xf32>
    %7 = tpu.iota {dimensions = array<i32: 1>} : vector<1x256xi32>
    %c128_i32 = arith.constant 128 : i32
    %c0_i32 = arith.constant 0 : i32
    %8 = arith.cmpi eq, %c128_i32, %c0_i32 : i32
    %c1_i32 = arith.constant 1 : i32
    %9 = arith.select %8, %c1_i32, %c128_i32 : i32
    %10 = vector.broadcast %9 : i32 to vector<1x256xi32>
    %11 = arith.remsi %7, %10 : vector<1x256xi32>
    %c0_i32_3 = arith.constant 0 : i32
    %12 = vector.broadcast %c0_i32_3 : i32 to vector<1x256xi32>
    %13 = arith.cmpi ne, %11, %12 : vector<1x256xi32>
    %c0_i32_4 = arith.constant 0 : i32
    %14 = vector.broadcast %c0_i32_4 : i32 to vector<1x256xi32>
    %15 = arith.cmpi slt, %11, %14 : vector<1x256xi32>
    %c0_i32_5 = arith.constant 0 : i32
    %16 = arith.cmpi slt, %9, %c0_i32_5 : i32
    %17 = vector.broadcast %16 : i1 to vector<1x256xi1>
    %18 = vector.broadcast %17 : vector<1x256xi1> to vector<1x256xi1>
    %19 = arith.xori %15, %18 : vector<1x256xi1>
    %20 = arith.andi %19, %13 : vector<1x256xi1>
    %21 = vector.broadcast %9 : i32 to vector<1x256xi32>
    %22 = arith.addi %11, %21 : vector<1x256xi32>
    %23 = arith.select %20, %22, %11 : vector<1x256xi1>, vector<1x256xi32>
    %c0_i32_6 = arith.constant 0 : i32
    %24 = vector.broadcast %c0_i32_6 : i32 to vector<1x256xi32>
    %25 = arith.cmpi ne, %23, %24 : vector<1x256xi32>
    %26 = arith.extui %25 : vector<1x256xi1> to vector<1x256xi32>
    %27 = arith.sitofp %26 : vector<1x256xi32> to vector<1x256xf32>
    %c127_i32 = arith.constant 127 : i32
    %28 = vector.broadcast %c127_i32 : i32 to vector<1x256xi32>
    %29 = arith.cmpi ne, %23, %28 : vector<1x256xi32>
    %30 = arith.extui %29 : vector<1x256xi1> to vector<1x256xi32>
    %31 = arith.sitofp %30 : vector<1x256xi32> to vector<1x256xf32>
    %cst = arith.constant dense<0.000000e+00> : vector<32xf32>
    %32 = vector.multi_reduction <add>, %0, %cst [1] : vector<32x256xf32> to vector<32xf32>
    %33 = vector.shape_cast %32 : vector<32xf32> to vector<32x1xf32>
    %cst_7 = arith.constant 2.560000e+02 : f32
    %34 = vector.broadcast %cst_7 : f32 to vector<32x1xf32>
    %35 = arith.divf %33, %34 : vector<32x1xf32>
    %36 = vector.broadcast %35 : vector<32x1xf32> to vector<32x256xf32>
    %37 = arith.subf %0, %36 : vector<32x256xf32>
    %38 = arith.mulf %37, %37 : vector<32x256xf32>
    %cst_8 = arith.constant dense<0.000000e+00> : vector<32xf32>
    %39 = vector.multi_reduction <add>, %38, %cst_8 [1] : vector<32x256xf32> to vector<32xf32>
    %40 = vector.shape_cast %39 : vector<32xf32> to vector<32x1xf32>
    %cst_9 = arith.constant 2.560000e+02 : f32
    %41 = vector.broadcast %cst_9 : f32 to vector<32x1xf32>
    %42 = arith.divf %40, %41 : vector<32x1xf32>
    %cst_10 = arith.constant 9.99999974E-6 : f32
    %43 = vector.broadcast %cst_10 : f32 to vector<32x1xf32>
    %44 = arith.addf %42, %43 : vector<32x1xf32>
    %45 = math.rsqrt %44 : vector<32x1xf32>
    %46 = vector.broadcast %45 : vector<32x1xf32> to vector<32x256xf32>
    %47 = arith.mulf %37, %46 : vector<32x256xf32>
    %48 = vector.broadcast %2 : vector<32x1xf32> to vector<32x256xf32>
    %49 = arith.mulf %47, %48 : vector<32x256xf32>
    %50 = vector.broadcast %3 : vector<32x1xf32> to vector<32x256xf32>
    %51 = arith.addf %49, %50 : vector<32x256xf32>
    %cst_11 = arith.constant 0.000000e+00 : f32
    %52 = vector.broadcast %cst_11 : f32 to vector<32x256xf32>
    %53 = arith.maximumf %51, %52 : vector<32x256xf32>
    %c0_12 = arith.constant 0 : index
    %c0_13 = arith.constant 0 : index
    %54 = vector.load %arg3[%c0_12, %c0_13] : memref<16x96xf32, #tpu.memory_space<vmem>>, vector<16x96xf32>
    %c1_i32_14 = arith.constant 1 : i32
    %55 = tpu.dynamic_rotate %53 by %c1_i32_14 dim 1 : vector<32x256xf32>, i32 -> vector<32x256xf32>
    %56 = vector.broadcast %27 : vector<1x256xf32> to vector<32x256xf32>
    %57 = arith.mulf %55, %56 : vector<32x256xf32>
    %c255_i32 = arith.constant 255 : i32
    %58 = tpu.dynamic_rotate %53 by %c255_i32 dim 1 : vector<32x256xf32>, i32 -> vector<32x256xf32>
    %59 = vector.broadcast %31 : vector<1x256xf32> to vector<32x256xf32>
    %60 = arith.mulf %58, %59 : vector<32x256xf32>
    %61 = tpu.concatenate %57, %53, %60 in 0 : vector<32x256xf32>, vector<32x256xf32>, vector<32x256xf32> -> vector<96x256xf32>
    %cst_15 = arith.constant dense<0.000000e+00> : vector<16x256xf32>
    %62 = tpu.matmul %54, %61, %cst_15 {dimension_numbers = #tpu.dot_dimension_numbers<[1], [0], [0], [1], [0, 0, 1, 1], [], []>} : vector<16x96xf32>, vector<96x256xf32>, vector<16x256xf32> -> vector<16x256xf32>
    %cst_16 = arith.constant dense<0.000000e+00> : vector<16xf32>
    %63 = vector.multi_reduction <add>, %62, %cst_16 [1] : vector<16x256xf32> to vector<16xf32>
    %64 = vector.shape_cast %63 : vector<16xf32> to vector<16x1xf32>
    %cst_17 = arith.constant 2.560000e+02 : f32
    %65 = vector.broadcast %cst_17 : f32 to vector<16x1xf32>
    %66 = arith.divf %64, %65 : vector<16x1xf32>
    %67 = vector.broadcast %66 : vector<16x1xf32> to vector<16x256xf32>
    %68 = arith.subf %62, %67 : vector<16x256xf32>
    %69 = arith.mulf %68, %68 : vector<16x256xf32>
    %cst_18 = arith.constant dense<0.000000e+00> : vector<16xf32>
    %70 = vector.multi_reduction <add>, %69, %cst_18 [1] : vector<16x256xf32> to vector<16xf32>
    %71 = vector.shape_cast %70 : vector<16xf32> to vector<16x1xf32>
    %cst_19 = arith.constant 2.560000e+02 : f32
    %72 = vector.broadcast %cst_19 : f32 to vector<16x1xf32>
    %73 = arith.divf %71, %72 : vector<16x1xf32>
    %cst_20 = arith.constant 9.99999974E-6 : f32
    %74 = vector.broadcast %cst_20 : f32 to vector<16x1xf32>
    %75 = arith.addf %73, %74 : vector<16x1xf32>
    %76 = math.rsqrt %75 : vector<16x1xf32>
    %77 = vector.broadcast %76 : vector<16x1xf32> to vector<16x256xf32>
    %78 = arith.mulf %68, %77 : vector<16x256xf32>
    %79 = vector.broadcast %4 : vector<16x1xf32> to vector<16x256xf32>
    %80 = arith.mulf %78, %79 : vector<16x256xf32>
    %81 = vector.broadcast %5 : vector<16x1xf32> to vector<16x256xf32>
    %82 = arith.addf %80, %81 : vector<16x256xf32>
    %cst_21 = arith.constant 0.000000e+00 : f32
    %83 = vector.broadcast %cst_21 : f32 to vector<16x256xf32>
    %84 = arith.maximumf %82, %83 : vector<16x256xf32>
    %c1_i32_22 = arith.constant 1 : i32
    %85 = tpu.dynamic_rotate %84 by %c1_i32_22 dim 1 : vector<16x256xf32>, i32 -> vector<16x256xf32>
    %86 = vector.broadcast %27 : vector<1x256xf32> to vector<16x256xf32>
    %87 = arith.mulf %85, %86 : vector<16x256xf32>
    %c255_i32_23 = arith.constant 255 : i32
    %88 = tpu.dynamic_rotate %84 by %c255_i32_23 dim 1 : vector<16x256xf32>, i32 -> vector<16x256xf32>
    %89 = vector.broadcast %31 : vector<1x256xf32> to vector<16x256xf32>
    %90 = arith.mulf %88, %89 : vector<16x256xf32>
    %91 = tpu.concatenate %87, %84, %90 in 0 : vector<16x256xf32>, vector<16x256xf32>, vector<16x256xf32> -> vector<48x256xf32>
    %92 = tpu.concatenate %91, %0 in 0 : vector<48x256xf32>, vector<32x256xf32> -> vector<80x256xf32>
    %c0_24 = arith.constant 0 : index
    %c0_25 = arith.constant 0 : index
    %93 = vector.load %arg4[%c0_24, %c0_25] : memref<16x80xf32, #tpu.memory_space<vmem>>, vector<16x80xf32>
    %cst_26 = arith.constant dense<0.000000e+00> : vector<16x256xf32>
    %94 = tpu.matmul %93, %92, %cst_26 {dimension_numbers = #tpu.dot_dimension_numbers<[1], [0], [0], [1], [0, 0, 1, 1], [], []>} : vector<16x80xf32>, vector<80x256xf32>, vector<16x256xf32> -> vector<16x256xf32>
    %95 = vector.broadcast %6 : vector<16x1xf32> to vector<16x256xf32>
    %96 = arith.addf %94, %95 : vector<16x256xf32>
    %c0_27 = arith.constant 0 : index
    %c0_28 = arith.constant 0 : index
    %97 = vector.load %arg5[%c0_27, %c0_28] : memref<16x256xf32, #tpu.memory_space<vmem>>, vector<16x256xf32>
    tpu.vector_store %arg5[%c0_27, %c0_28], %96 {strides = array<i32>} : memref<16x256xf32, #tpu.memory_space<vmem>>, vector<16x256xf32>,
    return
  }
  func.func @transform_0(%arg0: i32) -> (i32, i32) {
    %c0_i32 = arith.constant 0 : i32
    %c0_i32_0 = arith.constant 0 : i32
    %c0_i32_1 = arith.constant 0 : i32
    return %c0_i32, %c0_i32_0 : i32, i32
  }
  func.func @transform_1(%arg0: i32) -> (i32, i32) {
    %c0_i32 = arith.constant 0 : i32
    %c0_i32_0 = arith.constant 0 : i32
    %c0_i32_1 = arith.constant 0 : i32
    return %c0_i32, %c0_i32_0 : i32, i32
  }
  func.func @transform_2(%arg0: i32) -> (i32, i32) {
    %c0_i32 = arith.constant 0 : i32
    %c0_i32_0 = arith.constant 0 : i32
    %c0_i32_1 = arith.constant 0 : i32
    return %c0_i32, %c0_i32_0 : i32, i32
  }
  func.func @transform_3(%arg0: i32) -> (i32, i32) {
    %c0_i32 = arith.constant 0 : i32
    %c0_i32_0 = arith.constant 0 : i32
    %c0_i32_1 = arith.constant 0 : i32
    return %c0_i32, %c0_i32_0 : i32, i32
  }
  func.func @transform_4(%arg0: i32) -> (i32, i32) {
    %c0_i32 = arith.constant 0 : i32
    %c0_i32_0 = arith.constant 0 : i32
    %c0_i32_1 = arith.constant 0 : i32
    return %c0_i32, %c0_i32_0 : i32, i32
  }
}

</mosaic_0001>

<bundles_post_ra>
// kernel: tpu_custom_call.1
= control target key start
LH: loop header
LB: loop body
LE: loop exit
PB: predicated region body
PF: predicated region fallthrough
CT: control target
= control target key end

     0   :  { %9 = vsyncpa [#allocation3], 0  ;;  %s976_s0 = inlined_call_operand.hbm [shape: f32[32,256], index: 0, kind: input, shape index: {}]   ;;  %s977_s1 = inlined_call_operand.vmem [shape: f32[32,8], index: 1, kind: input, shape index: {}]   ;;  %s978_s2 = inlined_call_operand.vmem [shape: f32[16,96], index: 2, kind: input, shape index: {}]   ;;  %s979_s3 = inlined_call_operand.vmem [shape: f32[16,80], index: 3, kind: input, shape index: {}]   ;;  %s980_s4 = inlined_call_operand.hbm [shape: f32[16,256], index: 4, kind: output, shape index: {}]  }
   0x1   :  { %10 = vsyncpa [#allocation4], 0  ;;  %s15_s17 = sshll.u32 %s976_s0, 4  ;;  %s672_s18 = smov [#allocation2]   ;;  %s16_s17 = int_to_ptr.hbm [resolvable:$true] %s15_s17 }
   0x2   :  { %s17_s19 = sshll.u32 %s672_s18, 4  ;;  %s673_s20 = smov 256   ;;  %s18_s19 = int_to_ptr.vmem [resolvable:$true] %s17_s19 }
   0x3   :  { %s674_s21 = smov 16  }
   0x4   :  { %23 = dma.hbm_to_vmem [thread:$0]  %s16_s17, 1024, %s18_s19, [#allocation3], %s673_s20, %s673_s20, %s674_s21  }
   0x5   :  { %668 = dma.done.wait [#allocation3], 1024  }
   0x6   :  { %669 = vsyncadd [#allocation3], 4294966272  ;;  %v675_v0 = vmov 1   ;;  %v40_v1 = vld [vmem:[#allocation2 + $0x30] sm:$0xff]  ;;  %v41_v2 = vld [vmem:[#allocation2 + $0x38] sm:$0xff]  ;;  %v676_v12 = vmov 0  }
   0x7   :  { %596 = vset.pattern.permute.xlu1 %v675_v0  ;;  %v36_v3 = vld [vmem:[#allocation2 + $0x10] sm:$0xff]  ;;  %v94_v4 = vadd.f32 %v41_v2, %v40_v1  ;;  %v37_v5 = vld [vmem:[#allocation2 + $0x18] sm:$0xff]  ;;  %506 = vmatpush.msra.mxu2 %v40_v1  ;;  %v38_v7 = vld [vmem:[#allocation2 + $0x20] sm:$0xff]  ;;  %v677_v16 = vmov 256.0   ;;  %s679_s29 = smov 1   ;;  %s684_s11 = smov [#allocation5]  }
   0x8   :  { %529 = vmatpush.msra.mxu3 %v41_v2  ;;  %v88_v6 = vadd.f32 %v37_v5, %v36_v3  ;;  %v39_v8 = vld [vmem:[#allocation2 + $0x28] sm:$0xff]  ;;  %v34_v9 = vld [vmem:[#allocation2] sm:$0xff]  ;;  %v45_v11 = vld [vmem:[%s977_s1 + $0x18] sm:$0xff]  ;;  %594 = vset.pattern.permute.xlu2 %v676_v12  ;;  %606 = vrcp.f32 %v677_v16  ;;  %s554_s12 = sshll.u32 %s684_s11, 4  ;;  %s556_s15 = sshll.u32 %s980_s4, 4  ;;  %s555_s12 = int_to_ptr.vmem [resolvable:$true] %s554_s12  ;;  %s557_s15 = int_to_ptr.hbm [resolvable:$true] %s556_s15 }
   0x9   :  { %95 = vadd.xlane.f32.xlu0 %v94_v4  ;;  %507 = vmatpush.msra.mxu2 %v38_v7  ;;  %v35_v10 = vld [vmem:[#allocation2 + $0x8] sm:$0xff]  ;;  %v91_v13 = vadd.f32 %v39_v8, %v38_v7  ;;  %v723_v15 = vld [vmem:[%s977_s1] sm:$0xff]  ;;  %v44_v51 = vld [vmem:[%s977_s1 + $0x10] sm:$0xff] }
   0xa   :  { %89 = vadd.xlane.f32.xlu1 %v88_v6  ;;  %530 = vmatpush.msra.mxu3 %v39_v8  ;;  %v85_v14 = vadd.f32 %v35_v10, %v34_v9  ;;  %v771_v52 = vld [vmem:[%s977_s1 + $0x8] sm:$0xff]  ;;  %s678_s1 = smov 127  }
   0xb   :  { %508 = vmatpush.msra.mxu2 %v36_v3  ;;  %595 = vset.pattern.permute.xlu0 %v676_v12 }
   0xc   :  { %209 = vperm.xlu2 %594, %v45_v11   ;;  %531 = vmatpush.msra.mxu3 %v37_v5 }
   0xd   :  { %509 = vmatpush.msra.mxu2 %v34_v9 }
   0xe   :  { %532 = vmatpush.msra.mxu3 %v35_v10  ;;  %v607_v17 = vpop.eup %606 }
   0xf   :  { %v98_v18 = vmul.f32 256.0, %v607_v17  ;;  %vm102_vm0 = vweird.f32 %v607_v17 }
  0x11   :  { %92 = vadd.xlane.f32.xlu0 %v91_v13  ;;  %v99_v19 = vsub.f32 1.0, %v98_v18 }
  0x12   :  { %86 = vadd.xlane.f32.xlu1 %v85_v14 }
  0x13   :  { %v100_v20 = vmul.f32 %v607_v17, %v99_v19 }
  0x15   :  { %v101_v21 = vadd.f32 %v607_v17, %v100_v20 }
  0x17   :  { %v727_v22 = vsel %vm102_vm0, %v607_v17, %v101_v21 }
  0x2b   :  { %233 = vperm.xlu1 %596, %v45_v11  }
  0x33   :  { %598 = vset.pattern.permute.xlu1 %v676_v12 }
  0x34   :  { %194 = vperm.xlu1 %598, %v723_v15  }
  0x3c   :  { %599 = vset.pattern.permute.xlu1 %v675_v0 }
  0x66   :  { %v210_v54 = vpop.permute.xlu2 %209 }
  0x7c   :  { %v96_v23 = vpop.xlane.xlu0 %95 }
  0x7d   :  { %v107_v24 = vmul.f32 %v727_v22, %v96_v23  ;;  %v90_v25 = vpop.xlane.xlu1 %89 }
  0x7e   :  { %v105_v26 = vmul.f32 %v727_v22, %v90_v25 }
  0x7f   :  { %v731_v27 = vsub.f32 %v40_v1, %v107_v24  ;;  %v733_v28 = vsub.f32 %v41_v2, %v107_v24 }
  0x80   :  { %v735_v29 = vsub.f32 %v36_v3, %v105_v26  ;;  %v737_v30 = vsub.f32 %v37_v5, %v105_v26 }
  0x81   :  { %v122_v31 = vmul.f32 %v731_v27, %v731_v27  ;;  %v123_v32 = vmul.f32 %v733_v28, %v733_v28 }
  0x82   :  { %v118_v33 = vmul.f32 %v735_v29, %v735_v29  ;;  %v119_v34 = vmul.f32 %v737_v30, %v737_v30 }
  0x83   :  { %v133_v35 = vadd.f32 %v123_v32, %v122_v31 }
  0x84   :  { %v93_v36 = vpop.xlane.xlu0 %92  ;;  %v127_v37 = vadd.f32 %v119_v34, %v118_v33 }
  0x85   :  { %v106_v38 = vmul.f32 %v727_v22, %v93_v36  ;;  %v87_v39 = vpop.xlane.xlu1 %86  ;;  %134 = vadd.xlane.f32.xlu2 %v133_v35 }
  0x86   :  { %v104_v40 = vmul.f32 %v727_v22, %v87_v39  ;;  %128 = vadd.xlane.f32.xlu0 %v127_v37 }
  0x87   :  { %v749_v41 = vsub.f32 %v38_v7, %v106_v38  ;;  %v751_v42 = vsub.f32 %v39_v8, %v106_v38 }
  0x88   :  { %v753_v43 = vsub.f32 %v34_v9, %v104_v40  ;;  %v755_v44 = vsub.f32 %v35_v10, %v104_v40 }
  0x89   :  { %v120_v45 = vmul.f32 %v749_v41, %v749_v41  ;;  %v121_v46 = vmul.f32 %v751_v42, %v751_v42 }
  0x8a   :  { %v116_v47 = vmul.f32 %v753_v43, %v753_v43  ;;  %v117_v48 = vmul.f32 %v755_v44, %v755_v44 }
  0x8b   :  { %v130_v49 = vadd.f32 %v121_v46, %v120_v45 }
  0x8c   :  { %v124_v50 = vadd.f32 %v117_v48, %v116_v47 }
  0x8d   :  { %131 = vadd.xlane.f32.xlu2 %v130_v49 }
  0x8e   :  { %125 = vadd.xlane.f32.xlu1 %v124_v50 }
  0x9a   :  { %204 = vperm.xlu0 %595, %v44_v51  }
  0x9d   :  { %v234_v53 = vpop.permute.xlu1 %233 }
  0xa5   :  { %199 = vperm.xlu2 %594, %v771_v52  }
  0xa6   :  { %v777_v56 = vpop.permute.xlu1 %194 }
  0xa7   :  { %221 = vperm.xlu1 %599, %v723_v15  }
  0xad   :  { %597 = vset.pattern.permute.xlu2 %v675_v0 }
  0xae   :  { %229 = vperm.xlu2 %597, %v44_v51  }
  0xb6   :  { %225 = vperm.xlu2 %597, %v771_v52  }
  0xf8   :  { %v135_v55 = vpop.xlane.xlu2 %134 }
  0xf9   :  { %v139_v57 = vmul.f32 %v135_v55, %v727_v22  ;;  %v129_v58 = vpop.xlane.xlu0 %128 }
  0xfa   :  { %v137_v59 = vmul.f32 %v129_v58, %v727_v22 }
  0xfb   :  { %v143_v60 = vadd.f32 1e-05, %v139_v57 }
  0xfc   :  { %v141_v61 = vadd.f32 1e-05, %v137_v59 }
  0xfd   :  { %608 = vrsqrt.f32 %v143_v60  ;;  %vm180_vm4 = vweird.f32 %v143_v60 }
  0xfe   :  { %610 = vrsqrt.f32 %v141_v61  ;;  %vm160_vm2 = vweird.f32 %v141_v61 }
 0x100   :  { %v132_v62 = vpop.xlane.xlu2 %131 }
 0x101   :  { %v138_v63 = vmul.f32 %v132_v62, %v727_v22  ;;  %v126_v0 = vpop.xlane.xlu1 %125 }
 0x102   :  { %v136_v1 = vmul.f32 %v126_v0, %v727_v22 }
 0x103   :  { %v609_v2 = vpop.eup %608  ;;  %v142_v3 = vadd.f32 1e-05, %v138_v63 }
 0x104   :  { %v611_v4 = vpop.eup %610  ;;  %v175_v5 = vmul.f32 %v609_v2, %v143_v60  ;;  %v140_v6 = vadd.f32 1e-05, %v136_v1  ;;  %vm181_vm1 = vweird.f32 %v609_v2 }
 0x105   :  { %v155_v7 = vmul.f32 %v611_v4, %v141_v61  ;;  %612 = vrsqrt.f32 %v142_v3  ;;  %vm161_vm3 = vweird.f32 %v611_v4  ;;  %vm182_vm5 = vmor %vm180_vm4, %vm181_vm1  ;;  %vm170_vm10 = vweird.f32 %v142_v3 }
 0x106   :  { %v176_v8 = vmul.f32 %v609_v2, %v175_v5  ;;  %614 = vrsqrt.f32 %v140_v6  ;;  %vm162_vm6 = vmor %vm160_vm2, %vm161_vm3  ;;  %vm150_vm8 = vweird.f32 %v140_v6  ;;  %vm320_vm3 = vcmask 785408  }
 0x107   :  { %v156_v9 = vmul.f32 %v611_v4, %v155_v7 }
 0x108   :  { %v177_v10 = vmul.f32 0.5, %v176_v8  ;;  %v783_v11 = vpop.permute.xlu2 %199  ;;  %v46_v8 = vlaneseq }
 0x109   :  { %v157_v12 = vmul.f32 0.5, %v156_v9 }
 0x10a   :  { %v178_v13 = vsub.f32 1.5, %v177_v10  ;;  %v845_v9 = vand.u32 127, %v46_v8 }
 0x10b   :  { %v613_v14 = vpop.eup %612  ;;  %v158_v16 = vsub.f32 1.5, %v157_v12 }
 0x10c   :  { %v615_v17 = vpop.eup %614  ;;  %v179_v18 = vmul.f32 %v609_v2, %v178_v13  ;;  %v165_v19 = vmul.f32 %v613_v14, %v142_v3  ;;  %vm171_vm7 = vweird.f32 %v613_v14  ;;  %v205_v51 = vpop.permute.xlu0 %204  ;;  %v48_v10 = vadd.s32 128, %v845_v9 }
 0x10d   :  { %v145_v20 = vmul.f32 %v615_v17, %v140_v6  ;;  %v159_v21 = vmul.f32 %v611_v4, %v158_v16  ;;  %vm151_vm9 = vweird.f32 %v615_v17  ;;  %vm172_vm11 = vmor %vm170_vm10, %vm171_vm7  ;;  %vm79_vm13 = vcmp.ne.s32.totalorder %v845_v9, 127 }
 0x10e   :  { %v183_v23 = vsel %vm182_vm5, %v609_v2, %v179_v18  ;;  %v166_v24 = vmul.f32 %v613_v14, %v165_v19  ;;  %vm152_vm12 = vmor %vm150_vm8, %vm151_vm9  ;;  %vm303_vm15 = vcmp.lt.s32.totalorder %v845_v9, 127  ;;  %v680_v13 = vmov 0.0  }
 0x10f   :  { %v146_v25 = vmul.f32 %v615_v17, %v145_v20  ;;  %v163_v26 = vsel %vm162_vm6, %v611_v4, %v159_v21  ;;  %v191_v31 = vmul.f32 %v183_v23, %v733_v28  ;;  %v190_v32 = vmul.f32 %v183_v23, %v731_v27 }
 0x110   :  { %v167_v33 = vmul.f32 0.5, %v166_v24  ;;  %v230_v34 = vpop.permute.xlu2 %229  ;;  %v186_v39 = vmul.f32 %v163_v26, %v735_v29  ;;  %v187_v62 = vmul.f32 %v163_v26, %v737_v30  ;;  %vm270_vm0 = vcmp.lt.s32.totalorder %v845_v9, 1 }
 0x111   :  { %v147_v35 = vmul.f32 0.5, %v146_v25  ;;  %v219_v36 = vmul.f32 %v210_v54, %v191_v31  ;;  %v218_v37 = vmul.f32 %v210_v54, %v190_v32  ;;  %vm73_vm1 = vcmp.ne.s32.totalorder %v845_v9, 0  ;;  %v484_v9 = vld [vmem:[%s979_s3 + $0x8] sm:$0xff] }
 0x112   :  { %v168_v38 = vsub.f32 1.5, %v167_v33  ;;  %v214_v49 = vmul.f32 %v783_v11, %v186_v39  ;;  %v215_v5 = vmul.f32 %v783_v11, %v187_v62  ;;  %v60_v11 = vand.u32 127, %v48_v10 }
 0x113   :  { %v148_v40 = vsub.f32 1.5, %v147_v35  ;;  %v243_v45 = vadd.f32 %v234_v53, %v219_v36  ;;  %v242_v46 = vadd.f32 %v234_v53, %v218_v37  ;;  %vm493_vm10 = vcmask 654336  }
 0x114   :  { %v169_v47 = vmul.f32 %v613_v14, %v168_v38  ;;  %vm80_vm14 = vcmp.ne.s32.totalorder %v60_v11, 127  ;;  %vm74_vm2 = vcmp.ne.s32.totalorder %v60_v11, 0 }
 0x115   :  { %v149_v28 = vmul.f32 %v615_v17, %v148_v40  ;;  %v788_v48 = vmax.f32 %v243_v45, 0.0  ;;  %v790_v27 = vmax.f32 %v242_v46, 0.0  ;;  %v852_v16 = vsel %vm80_vm14, 1.0, %v680_v13 }
 0x116   :  { %v173_v50 = vsel %vm172_vm11, %v613_v14, %v169_v47  ;;  %v850_v14 = vsel %vm79_vm13, 1.0, %v680_v13 }
 0x117   :  { %301 = vrot.lane.b32.xlu2 %v788_v48, %s678_s1  ;;  %293 = vrot.lane.b32.xlu0 %v790_v27, %s678_s1  ;;  %v188_v29 = vmul.f32 %v173_v50, %v749_v41  ;;  %v189_v53 = vmul.f32 %v173_v50, %v751_v42  ;;  %v153_v54 = vsel %vm152_vm12, %v615_v17, %v149_v28 }
 0x118   :  { %v226_v55 = vpop.permute.xlu2 %225  ;;  %v185_v60 = vmul.f32 %v153_v54, %v755_v44  ;;  %v184_v61 = vmul.f32 %v153_v54, %v753_v43  ;;  %v888_v54 = vsel %vm73_vm1, 1.0, %v680_v13 }
 0x119   :  { %v238_v57 = vadd.f32 %v226_v55, %v214_v49  ;;  %v216_v58 = vmul.f32 %v205_v51, %v188_v29  ;;  %v217_v59 = vmul.f32 %v205_v51, %v189_v53  ;;  %v222_v4 = vpop.permute.xlu1 %221  ;;  %v239_v30 = vadd.f32 %v226_v55, %v215_v5 }
 0x11a   :  { %v213_v2 = vmul.f32 %v777_v56, %v185_v60  ;;  %v212_v3 = vmul.f32 %v777_v56, %v184_v61 }
 0x11b   :  { %v240_v63 = vadd.f32 %v230_v34, %v216_v58  ;;  %v241_v0 = vadd.f32 %v230_v34, %v217_v59  ;;  %v802_v1 = vmax.f32 %v238_v57, 0.0  ;;  %v817_v6 = vmax.f32 %v239_v30, 0.0 }
 0x11c   :  { %v237_v43 = vadd.f32 %v222_v4, %v213_v2  ;;  %v236_v44 = vadd.f32 %v222_v4, %v212_v3 }
 0x11d   :  { %v805_v41 = vmax.f32 %v240_v63, 0.0  ;;  %v807_v42 = vmax.f32 %v241_v0, 0.0 }
 0x11e   :  { %v819_v7 = vmax.f32 %v237_v43, 0.0  ;;  %v821_v56 = vmax.f32 %v236_v44, 0.0  ;;  %v252_v44 = vld [vmem:[%s978_s2] sm:$0xff] }
 0x11f   :  { %291 = vrot.lane.b32.xlu1 %v805_v41, %s678_s1  ;;  %289 = vrot.lane.b32.xlu2 %v802_v1, %s678_s1 }
 0x120   :  { %299 = vrot.lane.b32.xlu0 %v807_v42, %s678_s1 }
 0x127   :  { %297 = vrot.lane.b32.xlu1 %v817_v6, %s678_s1  ;;  %295 = vrot.lane.b32.xlu2 %v819_v7, %s678_s1 }
 0x128   :  { %287 = vrot.lane.b32.xlu0 %v821_v56, %s678_s1 }
 0x12f   :  { %260 = vrot.lane.b32.xlu1 %v790_v27, %s679_s29  ;;  %258 = vrot.lane.b32.xlu2 %v805_v41, %s679_s29 }
 0x130   :  { %268 = vrot.lane.b32.xlu0 %v788_v48, %s679_s29 }
 0x137   :  { %266 = vrot.lane.b32.xlu1 %v807_v42, %s679_s29  ;;  %264 = vrot.lane.b32.xlu2 %v817_v6, %s679_s29 }
 0x138   :  { %256 = vrot.lane.b32.xlu0 %v802_v1, %s679_s29 }
 0x13f   :  { %254 = vrot.lane.b32.xlu1 %v821_v56, %s679_s29 }
 0x140   :  { %262 = vrot.lane.b32.xlu0 %v819_v7, %s679_s29 }
 0x171   :  { %v302_v12 = vpop.permute.xlu2 %301 }
 0x179   :  { %v290_v23 = vpop.permute.xlu2 %289 }
 0x181   :  { %v296_v34 = vpop.permute.xlu2 %295 }
 0x189   :  { %v294_v17 = vpop.permute.xlu0 %293  ;;  %v259_v49 = vpop.permute.xlu2 %258 }
 0x18a   :  { %v307_v18 = vsel %vm303_vm15, %v294_v17, %v302_v12  ;;  %v311_v19 = vsel %vm303_vm15, %v302_v12, %v294_v17  ;;  %v682_v17 = vmov 3  }
 0x18b   :  { %v318_v20 = vmul.f32 %v850_v14, %v307_v18  ;;  %v319_v21 = vmul.f32 %v852_v16, %v311_v19  ;;  %602 = vset.pattern.permute.xlu0 %v682_v17 }
 0x18d   :  { %331 = vmatpush.msra.mxu0 %v318_v20  ;;  %354 = vmatpush.msra.mxu1 %v319_v21 }
 0x191   :  { %v292_v24 = vpop.permute.xlu1 %291  ;;  %v265_v58 = vpop.permute.xlu2 %264 }
 0x192   :  { %v300_v25 = vpop.permute.xlu0 %299 }
 0x193   :  { %v306_v26 = vsel %vm303_vm15, %v292_v24, %v300_v25  ;;  %v310_v31 = vsel %vm303_vm15, %v300_v25, %v292_v24 }
 0x194   :  { %v316_v32 = vmul.f32 %v850_v14, %v306_v26  ;;  %v317_v33 = vmul.f32 %v852_v16, %v310_v31 }
 0x196   :  { %332 = vmatpush.msra.mxu0 %v316_v32  ;;  %355 = vmatpush.msra.mxu1 %v317_v33 }
 0x199   :  { %v298_v35 = vpop.permute.xlu1 %297 }
 0x19a   :  { %v288_v36 = vpop.permute.xlu0 %287  ;;  %v305_v37 = vsel %vm303_vm15, %v290_v23, %v298_v35  ;;  %v309_v38 = vsel %vm303_vm15, %v298_v35, %v290_v23 }
 0x19b   :  { %v304_v39 = vsel %vm303_vm15, %v288_v36, %v296_v34  ;;  %v308_v40 = vsel %vm303_vm15, %v296_v34, %v288_v36  ;;  %v314_v45 = vmul.f32 %v850_v14, %v305_v37  ;;  %v315_v46 = vmul.f32 %v852_v16, %v309_v38 }
 0x19c   :  { %v312_v47 = vmul.f32 %v850_v14, %v304_v39  ;;  %v313_v28 = vmul.f32 %v852_v16, %v308_v40 }
 0x19d   :  { %333 = vmatpush.msra.mxu0 %v314_v45  ;;  %356 = vmatpush.msra.mxu1 %v315_v46 }
 0x19f   :  { %334 = vmatpush.msra.mxu0 %v312_v47  ;;  %357 = vmatpush.msra.mxu1 %v313_v28 }
 0x1a1   :  { %335 = vmatpush.msra.mxu0 %v790_v27  ;;  %358 = vmatpush.msra.mxu1 %v788_v48  ;;  %v261_v50 = vpop.permute.xlu1 %260  ;;  %v890_v27 = vsel %vm74_vm2, 1.0, %v680_v13  ;;  %v681_v13 = vmov 2  }
 0x1a2   :  { %v269_v51 = vpop.permute.xlu0 %268  ;;  %600 = vset.pattern.permute.xlu1 %v681_v13  ;;  %601 = vset.pattern.permute.xlu2 %v681_v13 }
 0x1a3   :  { %336 = vmatpush.msra.mxu0 %v805_v41  ;;  %359 = vmatpush.msra.mxu1 %v807_v42  ;;  %v274_v29 = vsel %vm270_vm0, %v261_v50, %v269_v51  ;;  %v278_v53 = vsel %vm270_vm0, %v269_v51, %v261_v50 }
 0x1a4   :  { %v285_v48 = vmul.f32 %v888_v54, %v278_v53  ;;  %v286_v55 = vmul.f32 %v890_v27, %v274_v29 }
 0x1a5   :  { %337 = vmatpush.msra.mxu0 %v802_v1  ;;  %360 = vmatpush.msra.mxu1 %v817_v6  ;;  %v253_v6 = vld [vmem:[%s978_s2 + $0x8] sm:$0xff] }
 0x1a7   :  { %338 = vmatpush.msra.mxu0 %v821_v56  ;;  %361 = vmatpush.msra.mxu1 %v819_v7 }
 0x1a9   :  { %339 = vmatpush.msra.mxu0 %v285_v48  ;;  %362 = vmatpush.msra.mxu1 %v286_v55  ;;  %v267_v57 = vpop.permute.xlu1 %266 }
 0x1aa   :  { %v257_v59 = vpop.permute.xlu0 %256  ;;  %v273_v60 = vsel %vm270_vm0, %v259_v49, %v267_v57  ;;  %v277_v61 = vsel %vm270_vm0, %v267_v57, %v259_v49 }
 0x1ab   :  { %v272_v62 = vsel %vm270_vm0, %v257_v59, %v265_v58  ;;  %v276_v63 = vsel %vm270_vm0, %v265_v58, %v257_v59  ;;  %v283_v0 = vmul.f32 %v888_v54, %v277_v61  ;;  %v284_v1 = vmul.f32 %v890_v27, %v273_v60 }
 0x1ac   :  { %v281_v2 = vmul.f32 %v888_v54, %v276_v63  ;;  %v282_v41 = vmul.f32 %v890_v27, %v272_v62 }
 0x1ad   :  { %340 = vmatpush.msra.mxu0 %v283_v0  ;;  %363 = vmatpush.msra.mxu1 %v284_v1 }
 0x1af   :  { %341 = vmatpush.msra.mxu0 %v281_v2  ;;  %364 = vmatpush.msra.mxu1 %v282_v41 }
 0x1b1   :  { %v255_v42 = vpop.permute.xlu1 %254 }
 0x1b2   :  { %v263_v3 = vpop.permute.xlu0 %262 }
 0x1b3   :  { %v271_v4 = vsel %vm270_vm0, %v255_v42, %v263_v3  ;;  %v275_v5 = vsel %vm270_vm0, %v263_v3, %v255_v42 }
 0x1b4   :  { %v279_v30 = vmul.f32 %v888_v54, %v275_v5  ;;  %v280_v43 = vmul.f32 %v890_v27, %v271_v4 }
 0x1b6   :  { %342 = vmatpush.msra.mxu0 %v279_v30  ;;  %365 = vmatpush.msra.mxu1 %v280_v43 }
 0x1b7   :  { %573 = vmatmul.msk.f32.vlgmr.msra.gmra.mxu0 %vm320_vm3, %v252_v44  ;;  %575 = vmatmul.msk.f32.vlgmr.msra.gmra.mxu1 %vm320_vm3, %v252_v44 }
 0x1bf   :  { %574 = vmatmul.msk.f32.gmra.mxu0 %vm320_vm3, %v253_v6  ;;  %576 = vmatmul.msk.f32.gmra.mxu1 %vm320_vm3, %v253_v6 }
 0x234   :  { %v344_v7 = vpop.f32.mrf.mxu0  ;;  %v367_v56 = vpop.f32.mrf.mxu1 }
 0x235   :  { %v373_v8 = vadd.f32 %v367_v56, %v344_v7 }
 0x237   :  { %374 = vadd.xlane.f32.xlu1 %v373_v8 }
 0x23c   :  { %v347_v10 = vpop.f32.mrf.mxu0  ;;  %v370_v11 = vpop.f32.mrf.mxu1 }
 0x23d   :  { %v376_v12 = vadd.f32 %v370_v11, %v347_v10 }
 0x23f   :  { %377 = vadd.xlane.f32.xlu2 %v376_v12 }
 0x250   :  { %428 = vperm.xlu1 %600, %v771_v52  }
 0x258   :  { %603 = vset.pattern.permute.xlu1 %v682_v17  ;;  %v683_v17 = vmov 4  }
 0x259   :  { %436 = vperm.xlu1 %603, %v723_v15  }
 0x261   :  { %605 = vset.pattern.permute.xlu1 %v683_v17 }
 0x2aa   :  { %v375_v18 = vpop.xlane.xlu1 %374 }
 0x2ab   :  { %v379_v19 = vmul.f32 %v375_v18, %v727_v22 }
 0x2ad   :  { %v381_v20 = vsub.f32 %v344_v7, %v379_v19  ;;  %v382_v21 = vsub.f32 %v367_v56, %v379_v19 }
 0x2af   :  { %v385_v23 = vmul.f32 %v381_v20, %v381_v20  ;;  %v386_v24 = vmul.f32 %v382_v21, %v382_v21 }
 0x2b1   :  { %v389_v25 = vadd.f32 %v386_v24, %v385_v23 }
 0x2b2   :  { %v378_v26 = vpop.xlane.xlu2 %377 }
 0x2b3   :  { %v380_v31 = vmul.f32 %v378_v26, %v727_v22  ;;  %390 = vadd.xlane.f32.xlu2 %v389_v25 }
 0x2b5   :  { %v383_v32 = vsub.f32 %v347_v10, %v380_v31  ;;  %v384_v33 = vsub.f32 %v370_v11, %v380_v31 }
 0x2b7   :  { %v387_v34 = vmul.f32 %v383_v32, %v383_v32  ;;  %v388_v35 = vmul.f32 %v384_v33, %v384_v33 }
 0x2b9   :  { %v392_v36 = vadd.f32 %v388_v35, %v387_v34 }
 0x2bb   :  { %393 = vadd.xlane.f32.xlu0 %v392_v36 }
 0x2c2   :  { %v429_v50 = vpop.permute.xlu1 %428 }
 0x2cb   :  { %424 = vperm.xlu2 %601, %v723_v15  }
 0x2cf   :  { %440 = vperm.xlu0 %602, %v771_v52  }
 0x2d7   :  { %604 = vset.pattern.permute.xlu0 %v683_v17 }
 0x326   :  { %v391_v37 = vpop.xlane.xlu2 %390 }
 0x327   :  { %v395_v38 = vmul.f32 %v391_v37, %v727_v22 }
 0x329   :  { %v397_v39 = vadd.f32 1e-05, %v395_v38 }
 0x32b   :  { %616 = vrsqrt.f32 %v397_v39  ;;  %vm405_vm5 = vweird.f32 %v397_v39 }
 0x32e   :  { %v394_v40 = vpop.xlane.xlu0 %393  ;;  %v425_v59 = vpop.permute.xlu2 %424 }
 0x32f   :  { %v396_v45 = vmul.f32 %v394_v40, %v727_v22  ;;  %v437_v22 = vpop.permute.xlu1 %436 }
 0x331   :  { %v617_v46 = vpop.eup %616  ;;  %v398_v47 = vadd.f32 1e-05, %v396_v45  ;;  %v483_v45 = vld [vmem:[%s979_s3] sm:$0xff] }
 0x332   :  { %v400_v28 = vmul.f32 %v617_v46, %v397_v39  ;;  %vm406_vm4 = vweird.f32 %v617_v46 }
 0x333   :  { %618 = vrsqrt.f32 %v398_v47  ;;  %vm407_vm6 = vmor %vm405_vm5, %vm406_vm4  ;;  %vm415_vm8 = vweird.f32 %v398_v47 }
 0x334   :  { %v401_v49 = vmul.f32 %v617_v46, %v400_v28 }
 0x336   :  { %v402_v51 = vmul.f32 0.5, %v401_v49 }
 0x338   :  { %v403_v29 = vsub.f32 1.5, %v402_v51 }
 0x339   :  { %v619_v53 = vpop.eup %618 }
 0x33a   :  { %v410_v48 = vmul.f32 %v619_v53, %v398_v47  ;;  %v404_v55 = vmul.f32 %v617_v46, %v403_v29  ;;  %vm416_vm7 = vweird.f32 %v619_v53 }
 0x33b   :  { %vm417_vm9 = vmor %vm415_vm8, %vm416_vm7 }
 0x33c   :  { %v411_v57 = vmul.f32 %v619_v53, %v410_v48  ;;  %v408_v58 = vsel %vm407_vm6, %v617_v46, %v404_v55 }
 0x33d   :  { %v419_v60 = vmul.f32 %v408_v58, %v381_v20  ;;  %v420_v43 = vmul.f32 %v408_v58, %v382_v21 }
 0x33e   :  { %v412_v61 = vmul.f32 0.5, %v411_v57 }
 0x33f   :  { %v431_v62 = vmul.f32 %v425_v59, %v419_v60  ;;  %v432_v7 = vmul.f32 %v425_v59, %v420_v43 }
 0x340   :  { %v413_v63 = vsub.f32 1.5, %v412_v61 }
 0x341   :  { %v443_v0 = vadd.f32 %v437_v22, %v431_v62  ;;  %v441_v4 = vpop.permute.xlu0 %440  ;;  %v444_v10 = vadd.f32 %v437_v22, %v432_v7 }
 0x342   :  { %v414_v1 = vmul.f32 %v619_v53, %v413_v63 }
 0x343   :  { %v447_v2 = vmax.f32 %v443_v0, 0.0  ;;  %v448_v11 = vmax.f32 %v444_v10, 0.0 }
 0x344   :  { %v418_v41 = vsel %vm417_vm9, %v619_v53, %v414_v1 }
 0x345   :  { %v421_v42 = vmul.f32 %v418_v41, %v383_v32  ;;  %v422_v3 = vmul.f32 %v418_v41, %v384_v33  ;;  %467 = vrot.lane.b32.xlu2 %v447_v2, %s678_s1 }
 0x347   :  { %v433_v5 = vmul.f32 %v429_v50, %v421_v42  ;;  %v434_v30 = vmul.f32 %v429_v50, %v422_v3 }
 0x349   :  { %v445_v44 = vadd.f32 %v441_v4, %v433_v5  ;;  %v446_v6 = vadd.f32 %v441_v4, %v434_v30 }
 0x34b   :  { %v449_v56 = vmax.f32 %v445_v44, 0.0  ;;  %v450_v8 = vmax.f32 %v446_v6, 0.0 }
 0x34d   :  { %457 = vrot.lane.b32.xlu0 %v450_v8, %s679_s29  ;;  %473 = vrot.lane.b32.xlu1 %v450_v8, %s678_s1 }
 0x34e   :  { %469 = vrot.lane.b32.xlu2 %v449_v56, %s678_s1 }
 0x355   :  { %471 = vrot.lane.b32.xlu1 %v448_v11, %s678_s1  ;;  %486 = vperm.xlu0 %604, %v723_v15  }
 0x356   :  { %453 = vrot.lane.b32.xlu2 %v449_v56, %s679_s29 }
 0x35d   :  { %451 = vrot.lane.b32.xlu1 %v447_v2, %s679_s29 }
 0x35e   :  { %455 = vrot.lane.b32.xlu2 %v448_v11, %s679_s29 }
 0x365   :  { %490 = vperm.xlu1 %605, %v771_v52  }
 0x39f   :  { %v468_v12 = vpop.permute.xlu2 %467 }
 0x3a8   :  { %v470_v13 = vpop.permute.xlu2 %469 }
 0x3b0   :  { %v454_v24 = vpop.permute.xlu2 %453 }
 0x3b8   :  { %v456_v35 = vpop.permute.xlu2 %455 }
 0x3bf   :  { %v474_v18 = vpop.permute.xlu1 %473  ;;  %v458_v26 = vpop.permute.xlu0 %457 }
 0x3c0   :  { %v476_v19 = vsel %vm303_vm15, %v470_v13, %v474_v18  ;;  %v478_v20 = vsel %vm303_vm15, %v474_v18, %v470_v13  ;;  %v460_v33 = vsel %vm270_vm0, %v454_v24, %v458_v26  ;;  %v462_v34 = vsel %vm270_vm0, %v458_v26, %v454_v24 }
 0x3c1   :  { %v481_v21 = vmul.f32 %v850_v14, %v476_v19  ;;  %v482_v23 = vmul.f32 %v852_v16, %v478_v20  ;;  %v465_v37 = vmul.f32 %v888_v54, %v462_v34 }
 0x3c3   :  { %510 = vmatpush.msra.mxu2 %v481_v21  ;;  %533 = vmatpush.msra.mxu3 %v482_v23 }
 0x3c7   :  { %v472_v25 = vpop.permute.xlu1 %471  ;;  %v487_v46 = vpop.permute.xlu0 %486 }
 0x3c8   :  { %v475_v15 = vsel %vm303_vm15, %v468_v12, %v472_v25  ;;  %v477_v52 = vsel %vm303_vm15, %v472_v25, %v468_v12 }
 0x3c9   :  { %v479_v31 = vmul.f32 %v850_v14, %v475_v15  ;;  %v480_v32 = vmul.f32 %v852_v16, %v477_v52  ;;  %v466_v14 = vmul.f32 %v890_v27, %v460_v33 }
 0x3cb   :  { %511 = vmatpush.msra.mxu2 %v479_v31  ;;  %534 = vmatpush.msra.mxu3 %v480_v32 }
 0x3cd   :  { %512 = vmatpush.msra.mxu2 %v449_v56  ;;  %535 = vmatpush.msra.mxu3 %v450_v8 }
 0x3cf   :  { %v452_v36 = vpop.permute.xlu1 %451  ;;  %513 = vmatpush.msra.mxu2 %v447_v2  ;;  %536 = vmatpush.msra.mxu3 %v448_v11 }
 0x3d0   :  { %v459_v16 = vsel %vm270_vm0, %v452_v36, %v456_v35  ;;  %v461_v38 = vsel %vm270_vm0, %v456_v35, %v452_v36 }
 0x3d1   :  { %514 = vmatpush.msra.mxu2 %v465_v37  ;;  %537 = vmatpush.msra.mxu3 %v466_v14  ;;  %v463_v39 = vmul.f32 %v888_v54, %v461_v38  ;;  %v464_v40 = vmul.f32 %v890_v27, %v459_v16 }
 0x3d3   :  { %515 = vmatpush.msra.mxu2 %v463_v39  ;;  %538 = vmatpush.msra.mxu3 %v464_v40 }
 0x3d4   :  { %577 = vmatmul.msk.f32.vlgmr.msra.gmra.mxu2 %vm493_vm10, %v483_v45  ;;  %579 = vmatmul.msk.f32.vlgmr.msra.gmra.mxu3 %vm493_vm10, %v483_v45 }
 0x3d7   :  { %v491_v49 = vpop.permute.xlu1 %490 }
 0x3dc   :  { %578 = vmatmul.msk.f32.gmra.mxu2 %vm493_vm10, %v484_v9  ;;  %580 = vmatmul.msk.f32.gmra.mxu3 %vm493_vm10, %v484_v9 }
 0x457   :  { %v517_v47 = vpop.f32.mrf.mxu2  ;;  %v540_v54 = vpop.f32.mrf.mxu3 }
 0x458   :  { %v518_v28 = vadd.f32 %v517_v47, %v487_v46  ;;  %v541_v27 = vadd.f32 %v540_v54, %v487_v46 }
 0x45a   :  { %546 = vst [vmem:[#allocation5] sm:$0xff] %v518_v28 }
 0x45b   :  { %547 = vst [vmem:[#allocation5 + $0x8] sm:$0xff] %v541_v27 }
 0x45f   :  { %v520_v50 = vpop.f32.mrf.mxu2  ;;  %v543_v51 = vpop.f32.mrf.mxu3 }
 0x460   :  { %v521_v29 = vadd.f32 %v520_v50, %v491_v49  ;;  %v544_v53 = vadd.f32 %v543_v51, %v491_v49 }
 0x462   :  { %548 = vst [vmem:[#allocation5 + $0x10] sm:$0xff] %v521_v29 }
 0x463   :  { %549 = vst [vmem:[#allocation5 + $0x18] sm:$0xff] %v544_v53 }
 0x464   :  { %562 = dma.vmem_to_hbm [thread:$0]  %s555_s12, 512, %s557_s15, [#allocation4], %s673_s20, %s673_s20, %s674_s21  }
 0x465   :  { %670 = dma.done.wait [#allocation4], 512  }
 0x466   :  { %671 = vsyncadd [#allocation4], 4294966784 }
 0x467   :  { %567 = vsyncpa [#allocation3], 1 }
 0x468   :  { %568 = vsyncpa [#allocation4], 1 }

</bundles_post_ra>
